<compile_context>
chip_gen: v6e
topology: v6e:2x2x1
jax: 0.10.0
libtpu: 0.0.40
codegen_flags: <defaults>
</compile_context>

<pallas_src>
import functools

import jax
import jax.numpy as jnp
from jax.experimental import pallas as pl
from jax.experimental.pallas import tpu as pltpu


def eve_top2_mlp_kernel(
    t1_ref,     # [tm, r+1]  (x @ A1^T + bA1 | 1)            matmul dtype
    t3_ref,     # [tm, r+1]  (x @ A3^T + bA3 | 1)
    b1t_ref,    # [r+1, tf]  rows: scaling*B1^T ; scaling*bB1 (F chunk)
    b3t_ref,    # [r+1, tf]  rows: scaling*B3^T ; scaling*bB3 (F chunk)
    a2t_ref,    # [tf, r]    A2^T                              (F chunk)
    b2t_ref,    # [r, H]     scaling*B2^T                      (resident)
    bias2_ref,  # [1, H]     scaling*(bA2 @ B2^T + bB2), f32   (resident)
    o_ref,      # [tm, H]
    acc_ref,    # scratch [tm, r] f32 : running (gated @ A2^T) accumulator
    *, gate_f32,
):
    # NOTE: the accumulator scheme requires the F axis to be the innermost
    # ("arbitrary", fastest-varying) grid axis: grid = (N//tm, F//tf).
    j = pl.program_id(1)

    @pl.when(j == 0)
    def _init():
        acc_ref[...] = jnp.zeros_like(acc_ref)

    # B-stage of w1 / w3; biases folded in via the trailing ones column of t.
    h1 = jnp.dot(t1_ref[...], b1t_ref[...], preferred_element_type=jnp.float32)
    h3 = jnp.dot(t3_ref[...], b3t_ref[...], preferred_element_type=jnp.float32)

    if not gate_f32:
        # bf16 gate: halves VPU/EUP + VMEM ld/st work on the [tm, tf]
        # intermediates (v6e/v7x have bf16 VPU/EUP). Use gate_f32=True on v5e.
        h1 = h1.astype(a2t_ref.dtype)
        h3 = h3.astype(a2t_ref.dtype)

    # silu(w1(h)) * w3(h) — sigmoid runs on the EUP (free slot vs. MXU/VALU).
    gated = (h1 * jax.nn.sigmoid(h1)) * h3

    acc_ref[...] += jnp.dot(gated.astype(a2t_ref.dtype), a2t_ref[...],
                            preferred_element_type=jnp.float32)

    @pl.when(j == pl.num_programs(1) - 1)
    def _finalize():
        y = jnp.dot(acc_ref[...].astype(b2t_ref.dtype), b2t_ref[...],
                    preferred_element_type=jnp.float32) + bias2_ref[...]
        o_ref[...] = y.astype(o_ref.dtype)


def _pick_tile(dim, want, multiple):
    """Largest t <= want with dim % t == 0 and (t % multiple == 0 or t == dim)."""
    want = max(1, min(want, dim))
    if dim % want == 0 and (want % multiple == 0 or want == dim):
        return want
    for t in range(want, 0, -1):
        if dim % t == 0 and (t % multiple == 0 or t == dim):
            return t
    return dim


def eve_top2_mlp(x, params, *, scaling, tm=None, tf=None,
                 matmul_dtype=jnp.bfloat16, gate_f32=False,
                 vmem_limit_bytes=48 * 1024 * 1024):
    """x: [..., hidden_dim] -> [..., hidden_dim].

    params use nn.Linear layout: weights [out, in], biases [1, out]
    (keys aN_w / aN_b / bN_w / bN_b for N in {1,2,3}).

    matmul_dtype : dtype fed to the MXU (default bf16; pass jnp.float32 for a
                   full-precision path, e.g. validation or v5e-with-f32-gate).
    gate_f32     : keep the silu*mul gate in f32 (recommended on v5e, which
                   has no bf16 VPU/EUP).
    tm / tf      : row tile / FFN chunk. v7x (64 MiB VMEM): prefer tm=512,
                   tf<=1024 or tm=256, tf=2048; v5e/v6e can grow tf further.
    """
    orig_shape = x.shape
    H = orig_shape[-1]
    x2 = x.reshape(-1, H)
    N = x2.shape[0]
    r = params["a1_w"].shape[0]
    F = params["b1_w"].shape[0]
    out_dtype = x.dtype
    f32 = jnp.float32
    md = jnp.dtype(matmul_dtype) if matmul_dtype is not None else jnp.dtype(f32)
    hp = jax.lax.Precision.HIGHEST

    # ---- A-stage hoisted out of the kernel: one XLA matmul covers A1 and A3.
    a13t = jnp.concatenate([params["a1_w"].T, params["a3_w"].T], axis=1)   # [H, 2r]
    t = jnp.dot(x2.astype(md), a13t.astype(md),
                preferred_element_type=f32, precision=hp)                  # [N, 2r]
    ones = jnp.ones((N, 1), f32)
    t1a = jnp.concatenate(
        [t[:, :r] + params["a1_b"].reshape(1, -1).astype(f32), ones], axis=1)
    t3a = jnp.concatenate(
        [t[:, r:] + params["a3_b"].reshape(1, -1).astype(f32), ones], axis=1)
    t1a = t1a.astype(md)                                                   # [N, r+1]
    t3a = t3a.astype(md)

    # ---- B-stage weights: scaling folded in, B-bias folded in as an extra K row.
    b1ta = jnp.concatenate([params["b1_w"].T * scaling,
                            params["b1_b"].reshape(1, -1) * scaling], axis=0)  # [r+1, F]
    b3ta = jnp.concatenate([params["b3_w"].T * scaling,
                            params["b3_b"].reshape(1, -1) * scaling], axis=0)  # [r+1, F]
    a2t = params["a2_w"].T                                                     # [F, r]
    b2t = params["b2_w"].T * scaling                                           # [r, H]
    bias2 = ((params["a2_b"].reshape(1, -1) @ params["b2_w"].T)
             + params["b2_b"].reshape(1, -1)) * scaling                        # [1, H]

    b1ta, b3ta = b1ta.astype(md), b3ta.astype(md)
    a2t, b2t = a2t.astype(md), b2t.astype(md)
    bias2 = bias2.astype(f32)       # added to the f32 accumulator

    # ---- Tile selection.
    if tm is None:
        tm = _pick_tile(N, 512, 8)
        # Prefer >=2 row tiles so the "parallel" axis can shard across the two
        # TensorCores on v7x (harmless on single-TC v5e/v6e).
        if N // tm < 2 and N >= 16:
            tm = _pick_tile(N, max(8, N // 2), 8)
    else:
        tm = min(tm, N)
        assert N % tm == 0, f"N={N} must be divisible by row tile tm={tm}"
    if tf is None:
        tf = _pick_tile(F, 2048, 128)
    else:
        tf = min(tf, F)
        assert F % tf == 0, f"F={F} must be divisible by ffn tile tf={tf}"

    grid = (N // tm, F // tf)   # F axis innermost ("arbitrary") — required.

    in_specs = [
        pl.BlockSpec((tm, r + 1), lambda i, j: (i, 0)),   # t1 aug (resident over j)
        pl.BlockSpec((tm, r + 1), lambda i, j: (i, 0)),   # t3 aug (resident over j)
        pl.BlockSpec((r + 1, tf), lambda i, j: (0, j)),   # scaled B1^T+bias chunk
        pl.BlockSpec((r + 1, tf), lambda i, j: (0, j)),   # scaled B3^T+bias chunk
        pl.BlockSpec((tf, r), lambda i, j: (j, 0)),       # A2^T chunk
        pl.BlockSpec((r, H), lambda i, j: (0, 0)),        # scaled B2^T (constant)
        pl.BlockSpec((1, H), lambda i, j: (0, 0)),        # folded bias2 (constant)
    ]

    kernel = functools.partial(eve_top2_mlp_kernel, gate_f32=bool(gate_f32))

    out = pl.pallas_call(
        kernel,
        out_shape=jax.ShapeDtypeStruct((N, H), out_dtype),
        grid_spec=pltpu.PrefetchScalarGridSpec(
            num_scalar_prefetch=0,
            grid=grid,
            in_specs=in_specs,
            out_specs=pl.BlockSpec((tm, H), lambda i, j: (i, 0)),
            scratch_shapes=[
                pltpu.VMEM((tm, r), jnp.float32),   # gated @ A2^T accumulator
            ],
        ),
        compiler_params=pltpu.CompilerParams(
            dimension_semantics=("parallel", "arbitrary"),
            vmem_limit_bytes=vmem_limit_bytes,
        ),
    )(t1a, t3a, b1ta, b3ta, a2t, b2t, bias2)

    return out.reshape(orig_shape)


def reference(x, params, scaling):
    """Pure-JAX f32 reference of EVETop2MLP.forward (high-precision dots)."""
    f32 = jnp.float32
    hp = jax.lax.Precision.HIGHEST
    x = x.astype(f32)

    def lin(v, aw, ab, bw, bb):
        h = jnp.dot(v, aw.T.astype(f32), precision=hp) + ab.reshape(1, -1).astype(f32)
        h = jnp.dot(h, bw.T.astype(f32), precision=hp) + bb.reshape(1, -1).astype(f32)
        return h * scaling

    h1 = lin(x, params["a1_w"], params["a1_b"], params["b1_w"], params["b1_b"])
    h3 = lin(x, params["a3_w"], params["a3_b"], params["b3_w"], params["b3_b"])
    g = jax.nn.silu(h1) * h3
    return lin(g, params["a2_w"], params["a2_b"], params["b2_w"], params["b2_b"])


if __name__ == "__main__":
    # Small but lane/sublane-friendly shapes (H, F multiples of 128).
    hidden_dim = 256
    ffn_dim = 512
    r = 16
    lora_alpha = 32
    scaling = lora_alpha / r          # EVELinear: lora_alpha / r
    batch, seq = 2, 64
    N = batch * seq

    key = jax.random.PRNGKey(0)
    keys = jax.random.split(key, 13)

    def w(k, shape):                  # nn.Linear weight layout: [out, in]
        return jax.random.normal(k, shape, jnp.float32) * 0.1

    params = {
        "a1_w": w(keys[0], (r, hidden_dim)),  "a1_b": w(keys[1], (1, r)),
        "b1_w": w(keys[2], (ffn_dim, r)),     "b1_b": w(keys[3], (1, ffn_dim)),
        "a3_w": w(keys[4], (r, hidden_dim)),  "a3_b": w(keys[5], (1, r)),
        "b3_w": w(keys[6], (ffn_dim, r)),     "b3_b": w(keys[7], (1, ffn_dim)),
        "a2_w": w(keys[8], (r, ffn_dim)),     "a2_b": w(keys[9], (1, r)),
        "b2_w": w(keys[10], (hidden_dim, r)), "b2_b": w(keys[11], (1, hidden_dim)),
    }
    x = jax.random.normal(keys[12], (N, hidden_dim), jnp.float32)

    ref = reference(x, params, scaling)
    scale = float(jnp.max(jnp.abs(ref))) + 1e-6

    # 1) Default path: bf16 matmuls + bf16 gate, auto tiles.
    out_bf16 = jax.block_until_ready(eve_top2_mlp(x, params, scaling=scaling))
    assert out_bf16.shape == (N, hidden_dim) and out_bf16.dtype == x.dtype
    err_bf16 = float(jnp.max(jnp.abs(out_bf16 - ref))) / scale
    assert err_bf16 < 5e-2, f"bf16 path rel-to-scale err = {err_bf16}"

    # 2) bf16 path with an explicit multi-step grid (exercises F accumulation
    #    and multiple row tiles).
    out_bf16_t = jax.block_until_ready(
        eve_top2_mlp(x, params, scaling=scaling, tm=64, tf=128))
    err_bf16_t = float(jnp.max(jnp.abs(out_bf16_t - ref))) / scale
    assert err_bf16_t < 5e-2, f"tiled bf16 path rel-to-scale err = {err_bf16_t}"

    # 3) Full-precision path (v5e-friendly: f32 matmuls + f32 gate), tight tol.
    out_f32 = jax.block_until_ready(
        eve_top2_mlp(x, params, scaling=scaling, tm=32, tf=128,
                     matmul_dtype=jnp.float32, gate_f32=True))
    err_f32 = float(jnp.max(jnp.abs(out_f32 - ref))) / scale
    assert err_f32 < 1e-3, f"f32 path rel-to-scale err = {err_f32}"

    print("KERNEL_OK")
</pallas_src>

<mosaic_0001>
module attributes {stable_mosaic.version = 11 : i64} {
  func.func @eve_top2_mlp_kernel(%arg0: i32, %arg1: i32, %arg2: memref<64x17xbf16, #tpu.memory_space<vmem>>, %arg3: memref<64x17xbf16, #tpu.memory_space<vmem>>, %arg4: memref<17x512xbf16, #tpu.memory_space<vmem>>, %arg5: memref<17x512xbf16, #tpu.memory_space<vmem>>, %arg6: memref<512x16xbf16, #tpu.memory_space<vmem>>, %arg7: memref<16x256xbf16, #tpu.memory_space<vmem>>, %arg8: memref<1x256xf32, #tpu.memory_space<vmem>>, %arg9: memref<64x256xf32, #tpu.memory_space<vmem>>, %arg10: memref<64x16xf32, #tpu.memory_space<vmem>>) attributes {dimension_semantics = [#tpu.dimension_semantics<parallel>, #tpu.dimension_semantics<arbitrary>], iteration_bounds = array<i64: 2, 1>, scalar_prefetch = 0 : i64, scratch_operands = 1 : i64, tpu.core_type = #tpu.core_type<tc>, window_params = [{transform_indices = @transform_0, window_bounds = array<i64: 64, 17>}, {transform_indices = @transform_1, window_bounds = array<i64: 64, 17>}, {transform_indices = @transform_2, window_bounds = array<i64: 17, 512>}, {transform_indices = @transform_3, window_bounds = array<i64: 17, 512>}, {transform_indices = @transform_4, window_bounds = array<i64: 512, 16>}, {pipeline_mode = #tpu.pipeline_mode<synchronous>, transform_indices = @transform_5, window_bounds = array<i64: 16, 256>}, {pipeline_mode = #tpu.pipeline_mode<synchronous>, transform_indices = @transform_6, window_bounds = array<i64: 1, 256>}, {transform_indices = @transform_7, window_bounds = array<i64: 64, 256>}]} {
    %c0_i32 = arith.constant 0 : i32
    %0 = arith.cmpi eq, %arg1, %c0_i32 : i32
    %1 = arith.extui %0 : i1 to i32
    %c0_i32_0 = arith.constant 0 : i32
    %2 = arith.cmpi ne, %1, %c0_i32_0 : i32
    scf.if %2 {
      %cst_19 = arith.constant 0.000000e+00 : f32
      %26 = vector.broadcast %cst_19 : f32 to vector<64x16xf32>
      %c0_20 = arith.constant 0 : index
      %c0_21 = arith.constant 0 : index
      %27 = vector.load %arg10[%c0_20, %c0_21] : memref<64x16xf32, #tpu.memory_space<vmem>>, vector<64x16xf32>
      tpu.vector_store %arg10[%c0_20, %c0_21], %26 {strides = array<i32>} : memref<64x16xf32, #tpu.memory_space<vmem>>, vector<64x16xf32>,
    } else {
    }
    %c0 = arith.constant 0 : index
    %c0_1 = arith.constant 0 : index
    %3 = vector.load %arg2[%c0, %c0_1] : memref<64x17xbf16, #tpu.memory_space<vmem>>, vector<64x17xbf16>
    %c0_2 = arith.constant 0 : index
    %c0_3 = arith.constant 0 : index
    %4 = vector.load %arg4[%c0_2, %c0_3] : memref<17x512xbf16, #tpu.memory_space<vmem>>, vector<17x512xbf16>
    %cst = arith.constant dense<0.000000e+00> : vector<64x512xf32>
    %5 = tpu.matmul %3, %4, %cst {dimension_numbers = #tpu.dot_dimension_numbers<[1], [0], [0], [1], [0, 0, 1, 1], [], []>} : vector<64x17xbf16>, vector<17x512xbf16>, vector<64x512xf32> -> vector<64x512xf32>
    %c0_4 = arith.constant 0 : index
    %c0_5 = arith.constant 0 : index
    %6 = vector.load %arg3[%c0_4, %c0_5] : memref<64x17xbf16, #tpu.memory_space<vmem>>, vector<64x17xbf16>
    %c0_6 = arith.constant 0 : index
    %c0_7 = arith.constant 0 : index
    %7 = vector.load %arg5[%c0_6, %c0_7] : memref<17x512xbf16, #tpu.memory_space<vmem>>, vector<17x512xbf16>
    %cst_8 = arith.constant dense<0.000000e+00> : vector<64x512xf32>
    %8 = tpu.matmul %6, %7, %cst_8 {dimension_numbers = #tpu.dot_dimension_numbers<[1], [0], [0], [1], [0, 0, 1, 1], [], []>} : vector<64x17xbf16>, vector<17x512xbf16>, vector<64x512xf32> -> vector<64x512xf32>
    %9 = arith.truncf %5 : vector<64x512xf32> to vector<64x512xbf16>
    %10 = arith.truncf %8 : vector<64x512xf32> to vector<64x512xbf16>
    %11 = arith.negf %9 : vector<64x512xbf16>
    %12 = math.exp %11 : vector<64x512xbf16>
    %cst_9 = arith.constant 1.000000e+00 : bf16
    %13 = vector.broadcast %cst_9 : bf16 to vector<64x512xbf16>
    %14 = arith.addf %13, %12 : vector<64x512xbf16>
    %15 = arith.divf %13, %14 : vector<64x512xbf16>
    %16 = arith.mulf %9, %15 : vector<64x512xbf16>
    %17 = arith.mulf %16, %10 : vector<64x512xbf16>
    %c0_10 = arith.constant 0 : index
    %c0_11 = arith.constant 0 : index
    %18 = vector.load %arg10[%c0_10, %c0_11] : memref<64x16xf32, #tpu.memory_space<vmem>>, vector<64x16xf32>
    %c0_12 = arith.constant 0 : index
    %c0_13 = arith.constant 0 : index
    %19 = vector.load %arg6[%c0_12, %c0_13] : memref<512x16xbf16, #tpu.memory_space<vmem>>, vector<512x16xbf16>
    %cst_14 = arith.constant dense<0.000000e+00> : vector<64x16xf32>
    %20 = tpu.matmul %17, %19, %cst_14 {dimension_numbers = #tpu.dot_dimension_numbers<[1], [0], [0], [1], [0, 0, 1, 1], [], []>} : vector<64x512xbf16>, vector<512x16xbf16>, vector<64x16xf32> -> vector<64x16xf32>
    %21 = arith.addf %18, %20 : vector<64x16xf32>
    %c0_15 = arith.constant 0 : index
    %c0_16 = arith.constant 0 : index
    %22 = vector.load %arg10[%c0_15, %c0_16] : memref<64x16xf32, #tpu.memory_space<vmem>>, vector<64x16xf32>
    tpu.vector_store %arg10[%c0_15, %c0_16], %21 {strides = array<i32>} : memref<64x16xf32, #tpu.memory_space<vmem>>, vector<64x16xf32>,
    %c0_i32_17 = arith.constant 0 : i32
    %23 = arith.cmpi eq, %arg1, %c0_i32_17 : i32
    %24 = arith.extui %23 : i1 to i32
    %c0_i32_18 = arith.constant 0 : i32
    %25 = arith.cmpi ne, %24, %c0_i32_18 : i32
    scf.if %25 {
      %c0_19 = arith.constant 0 : index
      %c0_20 = arith.constant 0 : index
      %26 = vector.load %arg10[%c0_19, %c0_20] : memref<64x16xf32, #tpu.memory_space<vmem>>, vector<64x16xf32>
      %27 = arith.truncf %26 : vector<64x16xf32> to vector<64x16xbf16>
      %c0_21 = arith.constant 0 : index
      %c0_22 = arith.constant 0 : index
      %28 = vector.load %arg7[%c0_21, %c0_22] : memref<16x256xbf16, #tpu.memory_space<vmem>>, vector<16x256xbf16>
      %cst_23 = arith.constant dense<0.000000e+00> : vector<64x256xf32>
      %29 = tpu.matmul %27, %28, %cst_23 {dimension_numbers = #tpu.dot_dimension_numbers<[1], [0], [0], [1], [0, 0, 1, 1], [], []>} : vector<64x16xbf16>, vector<16x256xbf16>, vector<64x256xf32> -> vector<64x256xf32>
      %c0_24 = arith.constant 0 : index
      %c0_25 = arith.constant 0 : index
      %30 = vector.load %arg8[%c0_24, %c0_25] : memref<1x256xf32, #tpu.memory_space<vmem>>, vector<1x256xf32>
      %31 = vector.broadcast %30 : vector<1x256xf32> to vector<64x256xf32>
      %32 = arith.addf %29, %31 : vector<64x256xf32>
      %c0_26 = arith.constant 0 : index
      %c0_27 = arith.constant 0 : index
      %33 = vector.load %arg9[%c0_26, %c0_27] : memref<64x256xf32, #tpu.memory_space<vmem>>, vector<64x256xf32>
      tpu.vector_store %arg9[%c0_26, %c0_27], %32 {strides = array<i32>} : memref<64x256xf32, #tpu.memory_space<vmem>>, vector<64x256xf32>,
    } else {
    }
    return
  }
  func.func @transform_0(%arg0: i32, %arg1: i32) -> (i32, i32) {
    %c0_i32 = arith.constant 0 : i32
    %c0_i32_0 = arith.constant 0 : i32
    return %arg0, %c0_i32 : i32, i32
  }
  func.func @transform_1(%arg0: i32, %arg1: i32) -> (i32, i32) {
    %c0_i32 = arith.constant 0 : i32
    %c0_i32_0 = arith.constant 0 : i32
    return %arg0, %c0_i32 : i32, i32
  }
  func.func @transform_2(%arg0: i32, %arg1: i32) -> (i32, i32) {
    %c0_i32 = arith.constant 0 : i32
    %c0_i32_0 = arith.constant 0 : i32
    return %c0_i32, %arg1 : i32, i32
  }
  func.func @transform_3(%arg0: i32, %arg1: i32) -> (i32, i32) {
    %c0_i32 = arith.constant 0 : i32
    %c0_i32_0 = arith.constant 0 : i32
    return %c0_i32, %arg1 : i32, i32
  }
  func.func @transform_4(%arg0: i32, %arg1: i32) -> (i32, i32) {
    %c0_i32 = arith.constant 0 : i32
    %c0_i32_0 = arith.constant 0 : i32
    return %arg1, %c0_i32 : i32, i32
  }
  func.func @transform_5(%arg0: i32, %arg1: i32) -> (i32, i32) {
    %c0_i32 = arith.constant 0 : i32
    %c0_i32_0 = arith.constant 0 : i32
    %c0_i32_1 = arith.constant 0 : i32
    return %c0_i32, %c0_i32_0 : i32, i32
  }
  func.func @transform_6(%arg0: i32, %arg1: i32) -> (i32, i32) {
    %c0_i32 = arith.constant 0 : i32
    %c0_i32_0 = arith.constant 0 : i32
    %c0_i32_1 = arith.constant 0 : i32
    return %c0_i32, %c0_i32_0 : i32, i32
  }
  func.func @transform_7(%arg0: i32, %arg1: i32) -> (i32, i32) {
    %c0_i32 = arith.constant 0 : i32
    %c0_i32_0 = arith.constant 0 : i32
    return %arg0, %c0_i32 : i32, i32
  }
}

</mosaic_0001>

<bundles_post_ra>
// kernel: tpu_custom_call.1
= control target key start
LH: loop header
LB: loop body
LE: loop exit
PB: predicated region body
PF: predicated region fallthrough
CT: control target
= control target key end

     0   :  { %12 = vsyncpa [#allocation4], 0  ;;  %s2706_s0 = inlined_call_operand.vmem [shape: bf16[128,17], index: 0, kind: input, shape index: {}]   ;;  %s2707_s1 = inlined_call_operand.vmem [shape: bf16[128,17], index: 1, kind: input, shape index: {}]   ;;  %s2708_s2 = inlined_call_operand.vmem [shape: bf16[17,512], index: 2, kind: input, shape index: {}]   ;;  %s2709_s3 = inlined_call_operand.vmem [shape: bf16[17,512], index: 3, kind: input, shape index: {}]   ;;  %s2710_s4 = inlined_call_operand.vmem [shape: bf16[512,16], index: 4, kind: input, shape index: {}]   ;;  %s2711_s5 = inlined_call_operand.vmem [shape: bf16[16,256], index: 5, kind: input, shape index: {}]   ;;  %s2712_s6 = inlined_call_operand.vmem [shape: f32[1,256], index: 6, kind: input, shape index: {}]   ;;  %s2713_s7 = inlined_call_operand.hbm [shape: f32[128,256], index: 7, kind: output, shape index: {}]  }
   0x1   :  { %14 = vsyncpa [#allocation4 + $0x1], 0  ;;  %s2244_s24 = smov 0   ;;  %s2246_s25 = smov 0  }
   0x2   :  { %s2248_s26 = smov 0   ;;  %s2250_s27 = smov 0  }
   0x3   :  { %s2252_s28 = smov 0   ;;  %s2254_s29 = smov 0  }
   0x4 LB: > { %s1736_s30 = sadd.s32 4294967295, %s2197_s29   ;;  %s1737_s8 = sadd.s32 4294967294, %s2197_s29   ;;  %s2197_s29 = sphi %s2254_s29, %s20_s29   ;;  %s2193_s28 = sphi %s2252_s28, %s2720_s28   ;;  %s2189_s27 = sphi %s2250_s27, %s2719_s27   ;;  %s2185_s26 = sphi %s2248_s26, %s2718_s26   ;;  %s2181_s25 = sphi %s2246_s25, %s2717_s25   ;;  %s2177_s24 = sphi %s2244_s24, %s2716_s24  }
   0x5   : > { %s32_s9 = sadd.s32 1, %s2193_s28  ;;  %s211_s10 = sadd.s32 1, %s2185_s26 }
   0x6   : > { %p34_p0 = scmp.ge.s32.totalorder %s32_s9, 2  ;;  %p221_p1 = scmp.ne.s32.totalorder %s2185_s26, %s2181_s25 }
   0x7   : > { %p222_p2 = scmp.eq.s32.totalorder %s1736_s30, 1  ;;  %p227_p3 = scmp.ne.s32.totalorder %s2181_s25, %s2177_s24 }
   0x8   : > { %s2722_s9 = smov (%p34_p0, %s32_s9), 0  ;;  %p228_p5 = scmp.eq.s32.totalorder %s1737_s8, 1 }
   0x9   : > { %p2284_p4 = por %p222_p2, %p221_p1  ;;  %s208_s12 = ssub.s32 %s2193_s28, %s2722_s9 }
   0xa   : > { %p1743_p6 = scmp.ge.s32.totalorder %s2197_s29, 1  ;;  %p209_p7 = scmp.eq.s32.totalorder %s208_s12, 0 }
   0xb   : > { %p2291_p8 = por %p228_p5, %p227_p3  ;;  %p297_p9 = scmp.lt.s32.totalorder %s2197_s29, 3 }
   0xc   : > { %s2297_s14 = scalar_select %p209_p7, %s2185_s26, %s211_s10  }
   0xd   : > { %p298_p10 = pnand %p1743_p6, %p297_p9 }
   0xe   : > { %s1745_s17 = sshll.u32 (!%p298_p10), %s2189_s27, 3  ;;  %s346_s30 = sand.u32 (!%p298_p10), 1, %s2181_s25  }
   0xf   : > { %301 = sbr.rel (%p298_p10) target bundleno = 748 (0x2ec), region = 48  ;;  %p350_p11 = scmp.lt.s32.totalorder (!%p298_p10), %s1745_s17, 15 }
  0x10   : > { %s1850_s16 = sshll.u32 (!%p298_p10), %s2189_s27, 11  ;;  %s2661_s27 = scalar_lea.sflag (!%p298_p10), [#allocation4], %s346_s30 }
  0x11   : > { %s2653_s20 = scalar_lea.hbm (!%p298_p10), %s2713_s7, %s1850_s16  ;;  %s2201_s22 = smov (!%p298_p10), [#allocation3]  }
  0x12   : > { %s2125_s23 = sshll.u32 (!%p298_p10), %s2201_s22, 4  ;;  %s2126_s23 = int_to_ptr.vmem [resolvable:$false] %s2125_s23 }
  0x13   : > { %s2127_s8 = scalar_lea.vmem (!%p298_p10), %s2126_s23, 4096 }
  0x14   : > { %v407_v0 = vld [vmem:[%s2708_s2 + $0x20] sm:$0x11]  ;;  %vm472_vm0 = vcmask 1040384   ;;  %v2199_v2 = vmov 0   ;;  %v408_v5 = vld [vmem:[%s2708_s2 + $0x28] sm:$0x11] }
  0x15   : > { %v1758_v1 = vcombine.high %v407_v0, %v407_v0  ;;  %v2303_v3 = vsel %vm472_vm0, 65535, %v2199_v2  ;;  %v1757_v4 = vcombine.low %v407_v0, %v407_v0  ;;  %519 = vmatprep.mubr.bf16.mxu0 %v2199_v2  ;;  %539 = vmatprep.mubr.bf16.mxu1 %v2199_v2  ;;  %v1996_v8 = vld [vmem:[%s2708_s2 + $0x4] ss:$16 sps:$4 sm:$0xff]   ;;  %v1760_v9 = vcombine.high %v408_v5, %v408_v5  ;;  %s2724_s17 = smov (!%p350_p11, %s1745_s17), 15  ;;  %v1998_v12 = vld [vmem:[%s2708_s2] ss:$16 sps:$4 sm:$0xff]  }
  0x16   : > { %v645_v10 = vld [vmem:[%s2709_s3 + $0x20] sm:$0x11]  ;;  %s1746_s10 = sshll.u32 %s2724_s17, 2  ;;  %v1759_v13 = vcombine.low %v408_v5, %v408_v5  ;;  %v646_v14 = vld [vmem:[%s2709_s3 + $0x28] sm:$0x11]  ;;  %vm459_vm1 = vcmask 138240  }
  0x17   : > { %v479_v6 = vand.u32 %v1758_v1, %v2303_v3  ;;  %v476_v7 = vand.u32 %v1757_v4, %v2303_v3  ;;  %v1778_v11 = vcombine.high %v645_v10, %v645_v10  ;;  %s353_s19 = scalar_lea.vmem %s2706_s0, %s1746_s10  ;;  %v485_v15 = vand.u32 %v1760_v9, %v2303_v3  ;;  %s2334_s21 = scalar_lea.vmem %s2707_s1, %s1746_s10  ;;  %v2007_v21 = vld [vmem:[%s2708_s2 + $0xc] ss:$16 sps:$4 sm:$0xff]   ;;  %v2005_v23 = vld [vmem:[%s2708_s2 + $0x8] ss:$16 sps:$4 sm:$0xff]   ;;  %v2012_v25 = vld [vmem:[%s2709_s3 + $0x4] ss:$16 sps:$4 sm:$0xff]  }
  0x18   : > { %v1999_v17 = vld [vmem:[%s353_s19] sm:$0xff]   ;;  %v1777_v18 = vcombine.low %v645_v10, %v645_v10  ;;  %v2000_v19 = vld [vmem:[%s353_s19 + $0x10] sm:$0xff]   ;;  %v482_v20 = vand.u32 %v1759_v13, %v2303_v3  ;;  %v1780_v22 = vcombine.high %v646_v14, %v646_v14  ;;  %v2003_v27 = vld [vmem:[%s353_s19 + $0x8] sm:$0xff]   ;;  %v1779_v30 = vcombine.low %v646_v14, %v646_v14  ;;  %s1744_s10 = sshll.u32 %s346_s30, 7 }
  0x19   : > { %499 = vmatprep.subr.bf16.mxu0 %v479_v6  ;;  %1931 = vmatprep.subr.bf16.mxu1 %v479_v6  ;;  %v713_v16 = vand.u32 %v1778_v11, %v2303_v3  ;;  %v2010_v26 = vld [vmem:[%s2709_s3] ss:$16 sps:$4 sm:$0xff]   ;;  %v2004_v28 = vld [vmem:[%s353_s19 + $0x18] sm:$0xff]   ;;  %v2016_v35 = vld [vmem:[%s2334_s21 + $0x8] sm:$0xff]   ;;  %vm386_vm2 = vcmask 130048   ;;  %s2632_s15 = scalar_lea.vmem [#allocation3], %s1744_s10 }
  0x1a   : > { %500 = vmatpush1.bf16.msra.mxu0 %v476_v7  ;;  %1933 = vmatpush1.bf16.msra.mxu1 %v476_v7  ;;  %v710_v24 = vand.u32 %v1777_v18, %v2303_v3  ;;  %v719_v29 = vand.u32 %v1780_v22, %v2303_v3  ;;  %v2013_v31 = vld [vmem:[%s2334_s21] sm:$0xff]   ;;  %v2020_v32 = vld [vmem:[%s2709_s3 + $0xc] ss:$16 sps:$4 sm:$0xff]   ;;  %v716_v33 = vand.u32 %v1779_v30, %v2303_v3  ;;  %v2018_v34 = vld [vmem:[%s2709_s3 + $0x8] ss:$16 sps:$4 sm:$0xff]   ;;  %s1609_s18 = sshll.u32 %s2632_s15, 4  ;;  %s2655_s18 = int_to_ptr.vmem [resolvable:$true] %s1609_s18 }
  0x1b   : > { %501 = vmatprep.subr.bf16.mxu0 %v1996_v8  ;;  %1932 = vmatprep.subr.bf16.mxu1 %v1996_v8  ;;  %v2017_v36 = vld [vmem:[%s2334_s21 + $0x10] sm:$0xff]   ;;  %v2021_v37 = vld [vmem:[%s2334_s21 + $0x18] sm:$0xff]   ;;  %v2026_v42 = vld [vmem:[%s2710_s4 + $0x68] sm:$0xff]   ;;  %s2121_s21 = scalar_lea.vmem %s2655_s18, 2048  ;;  %p2128_p1 = scmp.lt.s32.totalorder %s2655_s18, %s2126_s23 }
  0x1c   : > { %v2022_v38 = vld [vmem:[%s2710_s4 + $0x78] sm:$0xff]   ;;  %v2024_v40 = vld [vmem:[%s2710_s4 + $0x70] sm:$0xff]   ;;  %v2027_v43 = vld [vmem:[%s2710_s4 + $0x28] sm:$0xff]   ;;  %p2122_p12 = scmp.ne.s32.totalorder %s2655_s18, %s2121_s21  ;;  %p2129_p2 = scmp.lt.s32.totalorder %s2127_s8, %s2121_s21 }
  0x1d   : > { %v2023_v39 = vld [vmem:[%s2710_s4 + $0x38] sm:$0xff]   ;;  %v2025_v41 = vld [vmem:[%s2710_s4 + $0x30] sm:$0xff]   ;;  %v2028_v44 = vld [vmem:[%s2710_s4 + $0x60] sm:$0xff]  }
  0x1e   : > { %502 = vmatpush1.bf16.msra.mxu0 %v1998_v12  ;;  %1934 = vmatpush1.bf16.msra.mxu1 %v1998_v12  ;;  %v2029_v45 = vld [vmem:[%s2710_s4 + $0x20] sm:$0xff]   ;;  %v2030_v46 = vld [vmem:[%s2710_s4 + $0x58] sm:$0xff]   ;;  %v2034_v50 = vld [vmem:[%s2710_s4 + $0x50] sm:$0xff]   ;;  %p2123_p13 = pnand %p2122_p12, %p2284_p4  ;;  %p2130_p3 = por %p2129_p2, %p2128_p1 }
  0x1f   : > { %572 = vmatprep.subr.bf16.mxu1 %v485_v15  ;;  %733 = vmatprep.subr.bf16.mxu0 %v713_v16  ;;  %v2031_v47 = vld [vmem:[%s2710_s4 + $0xf8] sm:$0xff]   ;;  %v2035_v51 = vld [vmem:[%s2710_s4 + $0xf0] sm:$0xff]   ;;  %v2038_v54 = vld [vmem:[%s2710_s4 + $0x48] sm:$0xff]  }
  0x20   : > { %v2032_v48 = vld [vmem:[%s2710_s4 + $0x18] sm:$0xff]   ;;  %v2036_v52 = vld [vmem:[%s2710_s4 + $0x10] sm:$0xff]   ;;  %v2039_v55 = vld [vmem:[%s2710_s4 + $0xe8] sm:$0xff]   ;;  %p2124_p0 = pneg %p2123_p13 }
  0x21   : > { %1761 = vmatmul.mubr.msk.bf16.vlgmr.msra.gmra.mxu0 %vm459_vm1, %v1999_v17  ;;  %1763 = vmatmul.mubr.msk.bf16.vlgmr.msra.gmra.mxu1 %vm459_vm1, %v2000_v19  ;;  %v2033_v49 = vld [vmem:[%s2710_s4 + $0xb8] sm:$0xff]   ;;  %v2037_v53 = vld [vmem:[%s2710_s4 + $0xb0] sm:$0xff]   ;;  %v2040_v56 = vld [vmem:[%s2710_s4 + $0x8] sm:$0xff]  }
  0x22   : > { %573 = vmatpush1.bf16.msra.mxu1 %v482_v20  ;;  %529 = vmatprep.mubr.bf16.mxu0 %v2199_v2  ;;  %v2041_v57 = vld [vmem:[%s2710_s4 + $0xa8] sm:$0xff]   ;;  %v2042_v58 = vld [vmem:[%s2710_s4 + $0x40] sm:$0xff]   ;;  %v2046_v62 = vld [vmem:[%s2710_s4 + $0xd8] sm:$0xff]   ;;  %p2131_p5 = pnand %p2130_p3, %p2124_p0 }
  0x23   : > { %549 = vmatprep.mubr.bf16.mxu1 %v2199_v2  ;;  %574 = vmatprep.subr.bf16.mxu1 %v2007_v21  ;;  %v2043_v59 = vld [vmem:[%s2710_s4 + $0xe0] sm:$0xff]   ;;  %v2047_v63 = vld [vmem:[%s2710_s4 + $0x98] sm:$0xff]   ;;  %v2048_v0 = vld [vmem:[%s2710_s4 + $0xd0] sm:$0xff]  }
  0x24   : > { %734 = vmatpush1.bf16.msra.mxu0 %v710_v24  ;;  %v2044_v60 = vld [vmem:[%s2710_s4] sm:$0xff]   ;;  %v2049_v1 = vld [vmem:[%s2710_s4 + $0x90] sm:$0xff]   ;;  %v2050_v3 = vld [vmem:[%s2710_s4 + $0xc8] sm:$0xff]  }
  0x25   : > { %735 = vmatprep.subr.bf16.mxu0 %v2012_v25  ;;  %v2045_v61 = vld [vmem:[%s2710_s4 + $0xa0] sm:$0xff]   ;;  %v2051_v4 = vld [vmem:[%s2710_s4 + $0x88] sm:$0xff]  }
  0x26   : > { %575 = vmatpush1.bf16.msra.mxu1 %v2005_v23  ;;  %v2052_v5 = vld [vmem:[%s2710_s4 + $0xc0] sm:$0xff]  }
  0x27   : > { %806 = vmatprep.subr.bf16.mxu1 %v719_v29  ;;  %v2053_v6 = vld [vmem:[%s2710_s4 + $0x80] sm:$0xff]  }
  0x28   : > { %736 = vmatpush1.bf16.msra.mxu0 %v2010_v26 }
  0x29   : > { %1762 = vmatmul.mubr.msk.bf16.gmra.mxu0 %vm459_vm1, %v2003_v27  ;;  %1764 = vmatmul.mubr.msk.bf16.gmra.mxu1 %vm459_vm1, %v2004_v28 }
  0x2a   : > { %592 = vmatprep.mubr.bf16.mxu1 %v2199_v2  ;;  %753 = vmatprep.mubr.bf16.mxu0 %v2199_v2 }
  0x2b   : > { %1851 = vmatprep.subr.bf16.mxu0 %v2022_v38 }
  0x31   : > { %1765 = vmatmul.mubr.msk.bf16.vlgmr.msra.gmra.mxu1 %vm459_vm1, %v1999_v17  ;;  %1781 = vmatmul.mubr.msk.bf16.vlgmr.msra.gmra.mxu0 %vm459_vm1, %v2013_v31 }
  0x32   : > { %602 = vmatprep.mubr.bf16.mxu1 %v2199_v2  ;;  %807 = vmatpush1.bf16.msra.mxu1 %v716_v33 }
  0x33   : > { %763 = vmatprep.mubr.bf16.mxu0 %v2199_v2  ;;  %808 = vmatprep.subr.bf16.mxu1 %v2020_v32 }
  0x34   : > { %1852 = vmatpush3.bf16.msra.mxu0 %v2023_v39 }
  0x35   : > { %1853 = vmatprep.subr.bf16.mxu0 %v2024_v40 }
  0x36   : > { %809 = vmatpush1.bf16.msra.mxu1 %v2018_v34 }
  0x37   : > { %1891 = vmatprep.subr.bf16.mxu1 %v2031_v47 }
  0x38   : > { %1854 = vmatpush3.bf16.msra.mxu0 %v2025_v41 }
  0x39   : > { %1766 = vmatmul.mubr.msk.bf16.gmra.mxu1 %vm459_vm1, %v2003_v27  ;;  %1782 = vmatmul.mubr.msk.bf16.gmra.mxu0 %vm459_vm1, %v2016_v35 }
  0x3a   : > { %612 = vmatprep.mubr.bf16.mxu1 %v2199_v2  ;;  %773 = vmatprep.mubr.bf16.mxu0 %v2199_v2 }
  0x3b   : > { %1855 = vmatprep.subr.bf16.mxu0 %v2026_v42 }
  0x3c   : > { %1856 = vmatpush3.bf16.msra.mxu0 %v2027_v43 }
  0x3d   : > { %1857 = vmatprep.subr.bf16.mxu0 %v2028_v44 }
  0x40   : > { %1858 = vmatpush3.bf16.msra.mxu0 %v2029_v45 }
  0x41   : > { %1767 = vmatmul.mubr.msk.bf16.gmra.mxu1 %vm459_vm1, %v2000_v19  ;;  %1783 = vmatmul.mubr.msk.bf16.gmra.mxu0 %vm459_vm1, %v2017_v36 }
  0x42   : > { %622 = vmatprep.mubr.bf16.mxu1 %v2199_v2  ;;  %783 = vmatprep.mubr.bf16.mxu0 %v2199_v2 }
  0x43   : > { %1859 = vmatprep.subr.bf16.mxu0 %v2030_v46 }
  0x44   : > { %1860 = vmatpush3.bf16.msra.mxu0 %v2032_v48 }
  0x45   : > { %1861 = vmatprep.subr.bf16.mxu0 %v2034_v50 }
  0x48   : > { %1862 = vmatpush3.bf16.msra.mxu0 %v2036_v52 }
  0x49   : > { %1768 = vmatmul.mubr.msk.bf16.gmra.mxu1 %vm459_vm1, %v2004_v28  ;;  %1784 = vmatmul.mubr.msk.bf16.gmra.mxu0 %vm459_vm1, %v2021_v37 }
  0x4a   : > { %826 = vmatprep.mubr.bf16.mxu1 %v2199_v2  ;;  %1863 = vmatprep.subr.bf16.mxu0 %v2038_v54 }
  0x4c   : > { %1864 = vmatpush3.bf16.msra.mxu0 %v2040_v56 }
  0x4d   : > { %1865 = vmatprep.subr.bf16.mxu0 %v2042_v58 }
  0x50   : > { %1866 = vmatpush3.bf16.msra.mxu0 %v2044_v60 }
  0x51   : > { %1785 = vmatmul.mubr.msk.bf16.vlgmr.msra.gmra.mxu1 %vm459_vm1, %v2013_v31 }
  0x52   : > { %836 = vmatprep.mubr.bf16.mxu1 %v2199_v2  ;;  %1892 = vmatpush3.bf16.msra.mxu1 %v2033_v49 }
  0x53   : > { %1893 = vmatprep.subr.bf16.mxu1 %v2035_v51 }
  0x56   : > { %1894 = vmatpush3.bf16.msra.mxu1 %v2037_v53 }
  0x57   : > { %1895 = vmatprep.subr.bf16.mxu1 %v2039_v55 }
  0x59   : > { %1786 = vmatmul.mubr.msk.bf16.gmra.mxu1 %vm459_vm1, %v2016_v35 }
  0x5a   : > { %846 = vmatprep.mubr.bf16.mxu1 %v2199_v2  ;;  %1896 = vmatpush3.bf16.msra.mxu1 %v2041_v57 }
  0x5b   : > { %1897 = vmatprep.subr.bf16.mxu1 %v2043_v59 }
  0x5e   : > { %1898 = vmatpush3.bf16.msra.mxu1 %v2045_v61 }
  0x5f   : > { %1899 = vmatprep.subr.bf16.mxu1 %v2046_v62 }
  0x61   : > { %1787 = vmatmul.mubr.msk.bf16.gmra.mxu1 %vm459_vm1, %v2017_v36 }
  0x62   : > { %856 = vmatprep.mubr.bf16.mxu1 %v2199_v2  ;;  %1900 = vmatpush3.bf16.msra.mxu1 %v2047_v63 }
  0x63   : > { %1901 = vmatprep.subr.bf16.mxu1 %v2048_v0 }
  0x66   : > { %1902 = vmatpush3.bf16.msra.mxu1 %v2049_v1 }
  0x67   : > { %1903 = vmatprep.subr.bf16.mxu1 %v2050_v3 }
  0x69   : > { %1788 = vmatmul.mubr.msk.bf16.gmra.mxu1 %vm459_vm1, %v2021_v37 }
  0x6a   : > { %1904 = vmatpush3.bf16.msra.mxu1 %v2051_v4 }
  0x6b   : > { %1905 = vmatprep.subr.bf16.mxu1 %v2052_v5 }
  0x6e   : > { %1906 = vmatpush3.bf16.msra.mxu1 %v2053_v6 }
  0xe1   : > { %v521_v7 = vpop.f32.mrf.mxu0  ;;  %v541_v8 = vpop.f32.mrf.mxu1 }
  0xe3   : > { %v523_v9 = vpop.f32.mrf.mxu0  ;;  %v543_v10 = vpop.f32.mrf.mxu1 }
  0xe5   : > { %v525_v11 = vpop.f32.mrf.mxu0  ;;  %v545_v12 = vpop.f32.mrf.mxu1 }
  0xe6   : > { %v2487_v13 = vpack.c.bf16 %v525_v11, %v521_v7  ;;  %v2494_v19 = vpack.c.bf16 %v545_v12, %v541_v8 }
  0xe7   : > { %v527_v14 = vpop.f32.mrf.mxu0  ;;  %v547_v15 = vpop.f32.mrf.mxu1 }
  0xe8   : > { %v1789_v16 = vmul.bf16 3216621497, %v2487_v13  ;;  %v2490_v17 = vpack.c.bf16 %v527_v14, %v523_v9  ;;  %v2492_v18 = vpack.c.bf16 %v547_v15, %v543_v10  ;;  %v1797_v26 = vmul.bf16 3216621497, %v2494_v19 }
  0xe9   : > { %v531_v20 = vpop.f32.mrf.mxu0  ;;  %v551_v21 = vpop.f32.mrf.mxu1 }
  0xea   : > { %2057 = vpow.bf16 %v1789_v16  ;;  %v1790_v22 = vmul.bf16 3216621497, %v2490_v17  ;;  %v1798_v23 = vmul.bf16 3216621497, %v2492_v18 }
  0xeb   : > { %v533_v24 = vpop.f32.mrf.mxu0  ;;  %v553_v25 = vpop.f32.mrf.mxu1 }
  0xec   : > { %2059 = vpow.bf16 %v1790_v22 }
  0xed   : > { %2061 = vpow.bf16 %v1798_v23  ;;  %v535_v27 = vpop.f32.mrf.mxu0  ;;  %v555_v28 = vpop.f32.mrf.mxu1 }
  0xee   : > { %v2499_v29 = vpack.c.bf16 %v535_v27, %v531_v20  ;;  %2063 = vpow.bf16 %v1797_v26  ;;  %v2506_v35 = vpack.c.bf16 %v555_v28, %v551_v21 }
  0xef   : > { %v537_v30 = vpop.f32.mrf.mxu0  ;;  %v557_v31 = vpop.f32.mrf.mxu1 }
  0xf0   : > { %v1793_v32 = vmul.bf16 3216621497, %v2499_v29  ;;  %v2502_v33 = vpack.c.bf16 %v537_v30, %v533_v24  ;;  %v2504_v34 = vpack.c.bf16 %v557_v31, %v553_v25  ;;  %v1801_v42 = vmul.bf16 3216621497, %v2506_v35 }
  0xf1   : > { %v594_v36 = vpop.f32.mrf.mxu1  ;;  %v2508_v37 = vpop.f32.mrf.mxu0 }
  0xf2   : > { %2065 = vpow.bf16 %v1793_v32  ;;  %v1794_v38 = vmul.bf16 3216621497, %v2502_v33  ;;  %v1802_v39 = vmul.bf16 3216621497, %v2504_v34 }
  0xf3   : > { %v596_v40 = vpop.f32.mrf.mxu1  ;;  %v2512_v41 = vpop.f32.mrf.mxu0 }
  0xf4   : > { %2067 = vpow.bf16 %v1794_v38 }
  0xf5   : > { %2069 = vpow.bf16 %v1802_v39  ;;  %v598_v43 = vpop.f32.mrf.mxu1  ;;  %v2515_v44 = vpop.f32.mrf.mxu0 }
  0xf6   : > { %v2517_v45 = vpack.c.bf16 %v598_v43, %v594_v36  ;;  %2071 = vpow.bf16 %v1801_v42 }
  0xf7   : > { %v600_v46 = vpop.f32.mrf.mxu1  ;;  %v2519_v47 = vpop.f32.mrf.mxu0 }
  0xf8   : > { %v2058_v48 = vpop.eup %2057  ;;  %v1791_v49 = vmul.bf16 3216621497, %v2517_v45  ;;  %v2522_v50 = vpack.c.bf16 %v600_v46, %v596_v40 }
  0xf9   : > { %v963_v51 = vadd.bf16 1065369472, %v2058_v48  ;;  %v604_v52 = vpop.f32.mrf.mxu1  ;;  %v2524_v53 = vpop.f32.mrf.mxu0 }
  0xfa   : > { %v2060_v54 = vpop.eup %2059  ;;  %2073 = vpow.bf16 %v1791_v49  ;;  %v1792_v57 = vmul.bf16 3216621497, %v2522_v50  ;;  %v884_v49 = vpack.c.bf16 %v2519_v47, %v2512_v41 }
  0xfb   : > { %v2062_v55 = vpop.eup %2061  ;;  %2075 = vrcp.bf16 %v963_v51  ;;  %v964_v56 = vadd.bf16 1065369472, %v2060_v54  ;;  %v606_v58 = vpop.f32.mrf.mxu1  ;;  %v883_v54 = vpack.c.bf16 %v2515_v44, %v2508_v37 }
  0xfc   : > { %v2527_v59 = vpop.f32.mrf.mxu0  ;;  %v972_v60 = vadd.bf16 1065369472, %v2062_v55  ;;  %v2064_v0 = vpop.eup %2063 }
  0xfd   : > { %2077 = vrcp.bf16 %v964_v56  ;;  %v608_v61 = vpop.f32.mrf.mxu1  ;;  %v971_v11 = vadd.bf16 1065369472, %v2064_v0 }
  0xfe   : > { %v2529_v62 = vpop.f32.mrf.mxu0  ;;  %v2531_v63 = vpack.c.bf16 %v608_v61, %v604_v52  ;;  %2079 = vpow.bf16 %v1792_v57 }
  0xff   : > { %v610_v1 = vpop.f32.mrf.mxu1  ;;  %2081 = vrcp.bf16 %v972_v60 }
 0x100   : > { %v2533_v3 = vpop.f32.mrf.mxu0  ;;  %v2066_v4 = vpop.eup %2065  ;;  %v1795_v5 = vmul.bf16 3216621497, %v2531_v63  ;;  %v2536_v6 = vpack.c.bf16 %v610_v1, %v606_v58 }
 0x101   : > { %v967_v7 = vadd.bf16 1065369472, %v2066_v4  ;;  %v614_v8 = vpop.f32.mrf.mxu1 }
 0x102   : > { %v2538_v9 = vpop.f32.mrf.mxu0  ;;  %v2068_v10 = vpop.eup %2067  ;;  %2083 = vpow.bf16 %v1795_v5  ;;  %v1796_v15 = vmul.bf16 3216621497, %v2536_v6 }
 0x103   : > { %v2070_v12 = vpop.eup %2069  ;;  %2085 = vrcp.bf16 %v967_v7  ;;  %v968_v14 = vadd.bf16 1065369472, %v2068_v10  ;;  %v616_v16 = vpop.f32.mrf.mxu1 }
 0x104   : > { %v2541_v20 = vpop.f32.mrf.mxu0  ;;  %v976_v21 = vadd.bf16 1065369472, %v2070_v12  ;;  %v2072_v24 = vpop.eup %2071 }
 0x105   : > { %2087 = vrcp.bf16 %v968_v14  ;;  %v618_v22 = vpop.f32.mrf.mxu1  ;;  %v975_v42 = vadd.bf16 1065369472, %v2072_v24  ;;  %v887_v24 = vpack.c.bf16 %v2529_v62, %v2524_v53 }
 0x106   : > { %2089 = vrcp.bf16 %v971_v11  ;;  %v2543_v23 = vpack.c.bf16 %v618_v22, %v614_v8  ;;  %v2545_v26 = vpop.f32.mrf.mxu0 }
 0x107   : > { %2091 = vpow.bf16 %v1796_v15  ;;  %v620_v25 = vpop.f32.mrf.mxu1 }
 0x108   : > { %v2074_v27 = vpop.eup %2073  ;;  %v1799_v28 = vmul.bf16 3216621497, %v2543_v23  ;;  %v2548_v30 = vpack.c.bf16 %v620_v25, %v616_v16  ;;  %2093 = vrcp.bf16 %v976_v21  ;;  %v781_v46 = vpop.f32.mrf.mxu0  ;;  %v888_v16 = vpack.c.bf16 %v2533_v3, %v2527_v59 }
 0x109   : > { %v2076_v31 = vpop.eup %2075  ;;  %v965_v32 = vadd.bf16 1065369472, %v2074_v27  ;;  %v624_v36 = vpop.f32.mrf.mxu1 }
 0x10a   : > { %v980_v38 = vmul.bf16 1065369472, %v2076_v31  ;;  %2095 = vpow.bf16 %v1799_v28  ;;  %v1800_v39 = vmul.bf16 3216621497, %v2548_v30  ;;  %v2559_v0 = vpop.f32.mrf.mxu0 }
 0x10b   : > { %v2078_v40 = vpop.eup %2077  ;;  %2097 = vrcp.bf16 %v965_v32  ;;  %v626_v43 = vpop.f32.mrf.mxu1  ;;  %v892_v32 = vpack.c.bf16 %v781_v46, %v2541_v20 }
 0x10c   : > { %v982_v48 = vmul.bf16 1065369472, %v2078_v40  ;;  %2099 = vpow.bf16 %v1800_v39  ;;  %v2080_v51 = vpop.eup %2079  ;;  %v1011_v52 = vmul.bf16 %v980_v38, %v2487_v13  ;;  %v787_v11 = vpop.f32.mrf.mxu0 }
 0x10d   : > { %v628_v55 = vpop.f32.mrf.mxu1  ;;  %v966_v57 = vadd.bf16 1065369472, %v2080_v51  ;;  %v2082_v60 = vpop.eup %2081  ;;  %2101 = vrcp.bf16 %v975_v42 }
 0x10e   : > { %v1012_v56 = vmul.bf16 %v982_v48, %v2490_v17  ;;  %v2557_v58 = vpack.c.bf16 %v628_v55, %v624_v36  ;;  %v1027_v37 = vmul.bf16 %v1011_v52, %v883_v54  ;;  %v998_v17 = vmul.bf16 1065369472, %v2082_v60  ;;  %v2575_v38 = vpop.f32.mrf.mxu0 }
 0x10f   : > { %v630_v61 = vpop.f32.mrf.mxu1  ;;  %2103 = vrcp.bf16 %v966_v57  ;;  %v891_v52 = vpack.c.bf16 %v2545_v26, %v2538_v9 }
 0x110   : > { %v2084_v1 = vpop.eup %2083  ;;  %v1028_v41 = vmul.bf16 %v1012_v56, %v884_v49  ;;  %v1803_v47 = vmul.bf16 3216621497, %v2557_v58  ;;  %v2562_v13 = vpack.c.bf16 %v630_v61, %v626_v43  ;;  %v1020_v27 = vmul.bf16 %v998_v17, %v2492_v18  ;;  %v791_v20 = vpop.f32.mrf.mxu0 }
 0x111   : > { %v2086_v4 = vpop.eup %2085  ;;  %v969_v44 = vadd.bf16 1065369472, %v2084_v1  ;;  %v2564_v5 = vpop.f32.mrf.mxu1  ;;  %v896_v60 = vpack.c.bf16 %v791_v20, %v787_v11 }
 0x112   : > { %v988_v7 = vmul.bf16 1065369472, %v2086_v4  ;;  %2105 = vpow.bf16 %v1803_v47  ;;  %v1804_v8 = vmul.bf16 3216621497, %v2562_v13  ;;  %1339 = vmatprep.mubr.bf16.mxu0 %v1028_v41  ;;  %v1036_v48 = vmul.bf16 %v1020_v27, %v892_v32 }
 0x113   : > { %v2088_v10 = vpop.eup %2087  ;;  %2107 = vrcp.bf16 %v969_v44  ;;  %1340 = vmatmul.mubr.bf16.vlgmr.msra.gmra.mxu0 %v1027_v37  ;;  %v830_v12 = vpop.f32.mrf.mxu1 }
 0x114   : > { %v2090_v14 = vpop.eup %2089  ;;  %v990_v15 = vmul.bf16 1065369472, %v2088_v10  ;;  %2109 = vpow.bf16 %v1804_v8  ;;  %v1015_v22 = vmul.bf16 %v988_v7, %v2499_v29 }
 0x115   : > { %v2092_v21 = vpop.eup %2091  ;;  %v832_v25 = vpop.f32.mrf.mxu1  ;;  %v996_v3 = vmul.bf16 1065369472, %v2090_v14 }
 0x116   : > { %v1016_v28 = vmul.bf16 %v990_v15, %v2502_v33  ;;  %v970_v31 = vadd.bf16 1065369472, %v2092_v21  ;;  %v2094_v36 = vpop.eup %2093  ;;  %v1031_v42 = vmul.bf16 %v1015_v22, %v887_v24  ;;  %v885_v10 = vpack.c.bf16 %v832_v25, %v2564_v5 }
 0x117   : > { %v834_v39 = vpop.f32.mrf.mxu1  ;;  %v1006_v18 = vmul.bf16 1065369472, %v2094_v36  ;;  %v1019_v49 = vmul.bf16 %v996_v3, %v2494_v19 }
 0x118   : > { %v2096_v59 = vpop.eup %2095  ;;  %2111 = vrcp.bf16 %v970_v31  ;;  %v1032_v40 = vmul.bf16 %v1016_v28, %v888_v16  ;;  %v886_v9 = vpack.c.bf16 %v834_v39, %v830_v12 }
 0x119   : > { %v2098_v29 = vpop.eup %2097  ;;  %v973_v43 = vadd.bf16 1065369472, %v2096_v59  ;;  %v2577_v53 = vpop.f32.mrf.mxu1  ;;  %v1024_v57 = vmul.bf16 %v1006_v18, %v2504_v34  ;;  %v1035_v4 = vmul.bf16 %v1019_v49, %v891_v52 }
 0x11a   : > { %v2100_v62 = vpop.eup %2099  ;;  %1347 = vmatprep.mubr.bf16.mxu0 %v1032_v40  ;;  %v984_v51 = vmul.bf16 1065369472, %v2098_v29 }
 0x11b   : > { %2113 = vrcp.bf16 %v973_v43  ;;  %v974_v33 = vadd.bf16 1065369472, %v2100_v62  ;;  %1348 = vmatmul.mubr.bf16.gmra.mxu0 %v1031_v42  ;;  %v840_v46 = vpop.f32.mrf.mxu1  ;;  %v2102_v54 = vpop.eup %2101  ;;  %v1040_v8 = vmul.bf16 %v1024_v57, %v896_v60 }
 0x11c   : > { %1355 = vmatprep.mubr.bf16.mxu0 %v1036_v48  ;;  %v1013_v47 = vmul.bf16 %v984_v51, %v2517_v45  ;;  %v1004_v19 = vmul.bf16 1065369472, %v2102_v54 }
 0x11d   : > { %2115 = vrcp.bf16 %v974_v33  ;;  %v842_v55 = vpop.f32.mrf.mxu1  ;;  %v2104_v56 = vpop.eup %2103 }
 0x11e   : > { %v986_v61 = vmul.bf16 1065369472, %v2104_v56  ;;  %v1029_v16 = vmul.bf16 %v1013_v47, %v885_v10  ;;  %v1023_v45 = vmul.bf16 %v1004_v19, %v2506_v35  ;;  %v889_v35 = vpack.c.bf16 %v842_v55, %v2577_v53  ;;  %v2056_v55 = vld [vmem:[%s2711_s5 + $0x4] ss:$8 sps:$4 sm:$0xff]  }
 0x11f   : > { %v844_v1 = vpop.f32.mrf.mxu1  ;;  %1519 = vmatprep.subr.bf16.mxu0 %v2056_v55 }
 0x120   : > { %v2106_v41 = vpop.eup %2105  ;;  %v1014_v44 = vmul.bf16 %v986_v61, %v2522_v50  ;;  %v895_v50 = vpack.c.bf16 %v2575_v38, %v2559_v0  ;;  %v890_v31 = vpack.c.bf16 %v844_v1, %v840_v46 }
 0x121   : > { %v2108_v37 = vpop.eup %2107  ;;  %v977_v17 = vadd.bf16 1065369472, %v2106_v41  ;;  %v848_v26 = vpop.f32.mrf.mxu1 }
 0x122   : > { %v2110_v7 = vpop.eup %2109  ;;  %v1030_v11 = vmul.bf16 %v1014_v44, %v886_v9  ;;  %v992_v15 = vmul.bf16 1065369472, %v2108_v37  ;;  %v1039_v28 = vmul.bf16 %v1023_v45, %v895_v50 }
 0x123   : > { %2117 = vrcp.bf16 %v977_v17  ;;  %v978_v34 = vadd.bf16 1065369472, %v2110_v7  ;;  %1356 = vmatmul.mubr.bf16.gmra.mxu0 %v1035_v4  ;;  %v850_v14 = vpop.f32.mrf.mxu1 }
 0x124   : > { %1363 = vmatprep.mubr.bf16.mxu0 %v1040_v8  ;;  %1404 = vmatprep.mubr.bf16.mxu1 %v1030_v11  ;;  %v1017_v24 = vmul.bf16 %v992_v15, %v2531_v63 }
 0x125   : > { %2119 = vrcp.bf16 %v978_v34  ;;  %v852_v12 = vpop.f32.mrf.mxu1  ;;  %1405 = vmatmul.mubr.bf16.vlgmr.msra.gmra.mxu1 %v1029_v16 }
 0x126   : > { %v2112_v21 = vpop.eup %2111  ;;  %v1033_v3 = vmul.bf16 %v1017_v24, %v889_v35  ;;  %v893_v53 = vpack.c.bf16 %v852_v12, %v848_v26 }
 0x127   : > { %v994_v22 = vmul.bf16 1065369472, %v2112_v21  ;;  %v854_v5 = vpop.f32.mrf.mxu1 }
 0x128   : > { %v894_v40 = vpack.c.bf16 %v854_v5, %v850_v14 }
 0x129   : > { %v2114_v25 = vpop.eup %2113  ;;  %v1018_v27 = vmul.bf16 %v994_v22, %v2536_v6  ;;  %v858_v32 = vpop.f32.mrf.mxu1 }
 0x12a   : > { %v1000_v38 = vmul.bf16 1065369472, %v2114_v25 }
 0x12b   : > { %v2116_v36 = vpop.eup %2115  ;;  %v1034_v39 = vmul.bf16 %v1018_v27, %v890_v31  ;;  %1364 = vmatmul.mubr.bf16.gmra.mxu0 %v1039_v28  ;;  %v860_v0 = vpop.f32.mrf.mxu1 }
 0x12c   : > { %v1002_v59 = vmul.bf16 1065369472, %v2116_v36  ;;  %1537 = vmatprep.mubr.bf16.mxu0 %v2199_v2  ;;  %v1021_v29 = vmul.bf16 %v1000_v38, %v2543_v23  ;;  %v2054_v23 = vld [vmem:[%s2711_s5] ss:$8 sps:$4 sm:$0xff]  }
 0x12d   : > { %1412 = vmatprep.mubr.bf16.mxu1 %v1034_v39  ;;  %v862_v6 = vpop.f32.mrf.mxu1  ;;  %1520 = vmatpush1.bf16.msra.mxu0 %v2054_v23 }
 0x12e   : > { %v1022_v63 = vmul.bf16 %v1002_v59, %v2548_v30  ;;  %1413 = vmatmul.mubr.bf16.gmra.mxu1 %v1033_v3  ;;  %v1037_v20 = vmul.bf16 %v1021_v29, %v893_v53  ;;  %v897_v52 = vpack.c.bf16 %v862_v6, %v858_v32 }
 0x12f   : > { %v864_v18 = vpop.f32.mrf.mxu1 }
 0x130   : > { %v1038_v42 = vmul.bf16 %v1022_v63, %v894_v40  ;;  %v898_v49 = vpack.c.bf16 %v864_v18, %v860_v0 }
 0x131   : > { %v2118_v43 = vpop.eup %2117 }
 0x132   : > { %1420 = vmatprep.mubr.bf16.mxu1 %v1038_v42  ;;  %v1008_v48 = vmul.bf16 1065369472, %v2118_v43 }
 0x133   : > { %v2120_v62 = vpop.eup %2119 }
 0x134   : > { %v1010_v33 = vmul.bf16 1065369472, %v2120_v62  ;;  %v1025_v30 = vmul.bf16 %v1008_v48, %v2557_v58 }
 0x136   : > { %v1026_v46 = vmul.bf16 %v1010_v33, %v2562_v13  ;;  %1421 = vmatmul.mubr.bf16.gmra.mxu1 %v1037_v20  ;;  %v1041_v54 = vmul.bf16 %v1025_v30, %v897_v52  ;;  %v2200_v13 = vmov 0.0  }
 0x137   : > { %387 = vst.msk [vmem:[#allocation2] sm:$0xff] %vm386_vm2, %v2200_v13  ;;  %388 = vst.msk [vmem:[#allocation2 + $0x8] sm:$0xff] %vm386_vm2, %v2200_v13 }
 0x138   : > { %v1042_v51 = vmul.bf16 %v1026_v46, %v898_v49  ;;  %389 = vst.msk [vmem:[#allocation2 + $0x10] sm:$0xff] %vm386_vm2, %v2200_v13  ;;  %390 = vst.msk [vmem:[#allocation2 + $0x18] sm:$0xff] %vm386_vm2, %v2200_v13 }
 0x139   : > { %391 = vst.msk [vmem:[#allocation2 + $0x20] sm:$0xff] %vm386_vm2, %v2200_v13  ;;  %392 = vst.msk [vmem:[#allocation2 + $0x28] sm:$0xff] %vm386_vm2, %v2200_v13 }
 0x13a   : > { %1428 = vmatprep.mubr.bf16.mxu1 %v1042_v51  ;;  %393 = vst.msk [vmem:[#allocation2 + $0x30] sm:$0xff] %vm386_vm2, %v2200_v13  ;;  %394 = vst.msk [vmem:[#allocation2 + $0x38] sm:$0xff] %vm386_vm2, %v2200_v13 }
 0x13e   : > { %1429 = vmatmul.mubr.bf16.gmra.mxu1 %v1041_v54  ;;  %v1043_v26 = vld [vmem:[#allocation2] sm:$0xff]  ;;  %v1044_v16 = vld [vmem:[#allocation2 + $0x8] sm:$0xff] }
 0x13f   : > { %v1045_v25 = vld [vmem:[#allocation2 + $0x10] sm:$0xff]  ;;  %v1046_v0 = vld [vmem:[#allocation2 + $0x18] sm:$0xff] }
 0x140   : > { %v1047_v42 = vld [vmem:[#allocation2 + $0x20] sm:$0xff]  ;;  %v1048_v51 = vld [vmem:[#allocation2 + $0x28] sm:$0xff] }
 0x1d3   : > { %v1867_v58 = vpop.f32.mrf.mxu0 }
 0x1d5   : > { %v1868_v56 = vpop.f32.mrf.mxu0 }
 0x1d6   : > { %v1869_v44 = vadd.f32 %v1868_v56, %v1867_v58 }
 0x1d7   : > { %v1870_v57 = vpop.f32.mrf.mxu0 }
 0x1d9   : > { %v1871_v60 = vpop.f32.mrf.mxu0 }
 0x1da   : > { %v1872_v34 = vadd.f32 %v1871_v60, %v1870_v57  ;;  %v1049_v57 = vld [vmem:[#allocation2 + $0x30] sm:$0xff] }
 0x1db   : > { %v1873_v61 = vpop.f32.mrf.mxu0 }
 0x1dd   : > { %v1874_v1 = vpop.f32.mrf.mxu0 }
 0x1de   : > { %v1875_v21 = vadd.f32 %v1874_v1, %v1873_v61 }
 0x1df   : > { %v1876_v41 = vpop.f32.mrf.mxu0 }
 0x1e1   : > { %v1877_v47 = vpop.f32.mrf.mxu0 }
 0x1e2   : > { %v1878_v32 = vadd.f32 %v1877_v47, %v1876_v41 }
 0x1e3   : > { %v1879_v4 = vpop.f32.mrf.mxu0 }
 0x1e5   : > { %v1907_v37 = vpop.f32.mrf.mxu1  ;;  %v1880_v9 = vpop.f32.mrf.mxu0 }
 0x1e6   : > { %v1881_v63 = vadd.f32 %v1880_v9, %v1879_v4 }
 0x1e7   : > { %v1908_v19 = vpop.f32.mrf.mxu1  ;;  %v1882_v15 = vpop.f32.mrf.mxu0 }
 0x1e8   : > { %v1909_v17 = vadd.f32 %v1908_v19, %v1907_v37 }
 0x1e9   : > { %v1910_v7 = vpop.f32.mrf.mxu1  ;;  %v1883_v24 = vpop.f32.mrf.mxu0 }
 0x1ea   : > { %v1407_v8 = vadd.f32 %v1909_v17, %v1869_v44  ;;  %v1884_v20 = vadd.f32 %v1883_v24, %v1882_v15  ;;  %v1050_v17 = vld [vmem:[#allocation2 + $0x38] sm:$0xff]  ;;  %v1473_v15 = vlaneseq }
 0x1eb   : > { %v1911_v10 = vpop.f32.mrf.mxu1  ;;  %v1885_v39 = vpop.f32.mrf.mxu0 }
 0x1ec   : > { %v1437_v11 = vadd.f32 %v1407_v8, %v1043_v26  ;;  %v1912_v14 = vadd.f32 %v1911_v10, %v1910_v7 }
 0x1ed   : > { %v1886_v29 = vpop.f32.mrf.mxu0 }
 0x1ee   : > { %v1913_v45 = vpop.f32.mrf.mxu1  ;;  %1446 = vst.msk [vmem:[#allocation2] sm:$0xff] %vm386_vm2, %v1437_v11  ;;  %v1410_v50 = vadd.f32 %v1912_v14, %v1872_v34  ;;  %v1887_v55 = vadd.f32 %v1886_v29, %v1885_v39 }
 0x1ef   : > { %v1888_v30 = vpop.f32.mrf.mxu0 }
 0x1f0   : > { %v1914_v12 = vpop.f32.mrf.mxu1  ;;  %v1438_v22 = vadd.f32 %v1410_v50, %v1044_v16  ;;  %v1474_v16 = vshrl.u32 %v1473_v15, 7  ;;  %v1471_v50 = vld [vmem:[%s2712_s6] sm:$0x3] }
 0x1f1   : > { %v1915_v5 = vadd.f32 %v1914_v12, %v1913_v45  ;;  %v1889_v56 = vpop.f32.mrf.mxu0 }
 0x1f2   : > { %v1916_v27 = vpop.f32.mrf.mxu1  ;;  %1447 = vst.msk [vmem:[#allocation2 + $0x8] sm:$0xff] %vm386_vm2, %v1438_v22  ;;  %v1890_v37 = vadd.f32 %v1889_v56, %v1888_v30  ;;  %v1475_v45 = vsub.s32 0, %v1474_v16  ;;  %v1479_v12 = vsub.s32 1, %v1474_v16 }
 0x1f3   : > { %v1415_v28 = vadd.f32 %v1915_v5, %v1875_v21 }
 0x1f4   : > { %v1917_v31 = vpop.f32.mrf.mxu1  ;;  %v1476_v21 = vrot.slane %v1471_v50, %v1475_v45  ;;  %v1480_v22 = vrot.slane %v1471_v50, %v1479_v12 }
 0x1f5   : > { %v1439_v35 = vadd.f32 %v1415_v28, %v1045_v25  ;;  %v1918_v36 = vadd.f32 %v1917_v31, %v1916_v27  ;;  %v1457_v53 = vld [vmem:[#allocation2] sm:$0xff] }
 0x1f6   : > { %v1919_v38 = vpop.f32.mrf.mxu1 }
 0x1f7   : > { %1448 = vst.msk [vmem:[#allocation2 + $0x10] sm:$0xff] %vm386_vm2, %v1439_v35  ;;  %v1418_v59 = vadd.f32 %v1918_v36, %v1878_v32 }
 0x1f8   : > { %v1920_v3 = vpop.f32.mrf.mxu1 }
 0x1f9   : > { %v1440_v40 = vadd.f32 %v1418_v59, %v1046_v0  ;;  %v1921_v6 = vadd.f32 %v1920_v3, %v1919_v38  ;;  %v1458_v62 = vld [vmem:[#allocation2 + $0x8] sm:$0xff] }
 0x1fa   : > { %v1922_v43 = vpop.f32.mrf.mxu1  ;;  %v1465_v48 = vpack.c.bf16 %v1458_v62, %v1457_v53 }
 0x1fb   : > { %1449 = vst.msk [vmem:[#allocation2 + $0x18] sm:$0xff] %vm386_vm2, %v1440_v40  ;;  %v1423_v18 = vadd.f32 %v1921_v6, %v1881_v63 }
 0x1fc   : > { %v1923_v33 = vpop.f32.mrf.mxu1  ;;  %1839 = vmatmul.mubr.msk.bf16.vlgmr.msra.gmra.mxu0 %vm386_vm2, %v1465_v48 }
 0x1fd   : > { %v1441_v46 = vadd.f32 %v1423_v18, %v1047_v42  ;;  %v1924_v49 = vadd.f32 %v1923_v33, %v1922_v43  ;;  %1547 = vmatprep.mubr.bf16.mxu0 %v2199_v2 }
 0x1fe   : > { %v1925_v52 = vpop.f32.mrf.mxu1  ;;  %v1459_v61 = vld [vmem:[#allocation2 + $0x10] sm:$0xff] }
 0x1ff   : > { %1450 = vst.msk [vmem:[#allocation2 + $0x20] sm:$0xff] %vm386_vm2, %v1441_v46  ;;  %v1426_v54 = vadd.f32 %v1924_v49, %v1884_v20 }
 0x200   : > { %v1926_v23 = vpop.f32.mrf.mxu1 }
 0x201   : > { %v1442_v13 = vadd.f32 %v1426_v54, %v1048_v51  ;;  %v1927_v58 = vadd.f32 %v1926_v23, %v1925_v52 }
 0x202   : > { %v1928_v60 = vpop.f32.mrf.mxu1  ;;  %v1460_v1 = vld [vmem:[#allocation2 + $0x18] sm:$0xff] }
 0x203   : > { %1451 = vst.msk [vmem:[#allocation2 + $0x28] sm:$0xff] %vm386_vm2, %v1442_v13  ;;  %v1431_v41 = vadd.f32 %v1927_v58, %v1887_v55  ;;  %v1466_v47 = vpack.c.bf16 %v1460_v1, %v1459_v61 }
 0x204   : > { %v1929_v4 = vpop.f32.mrf.mxu1 }
 0x205   : > { %v1443_v19 = vadd.f32 %v1431_v41, %v1049_v57  ;;  %v1930_v44 = vadd.f32 %v1929_v4, %v1928_v60  ;;  %1840 = vmatmul.mubr.msk.bf16.gmra.mxu0 %vm386_vm2, %v1466_v47 }
 0x206   : > { %1557 = vmatprep.mubr.bf16.mxu0 %v2199_v2  ;;  %v1461_v7 = vld [vmem:[#allocation2 + $0x20] sm:$0xff] }
 0x207   : > { %1452 = vst.msk [vmem:[#allocation2 + $0x30] sm:$0xff] %vm386_vm2, %v1443_v19  ;;  %v1434_v9 = vadd.f32 %v1930_v44, %v1890_v37 }
 0x209   : > { %v1444_v26 = vadd.f32 %v1434_v9, %v1050_v17 }
 0x20a   : > { %v1462_v8 = vld [vmem:[#allocation2 + $0x28] sm:$0xff] }
 0x20b   : > { %1453 = vst.msk [vmem:[#allocation2 + $0x38] sm:$0xff] %vm386_vm2, %v1444_v26  ;;  %v1467_v10 = vpack.c.bf16 %v1462_v8, %v1461_v7 }
 0x20d   : > { %1841 = vmatmul.mubr.msk.bf16.gmra.mxu0 %vm386_vm2, %v1467_v10 }
 0x20e   : > { %1567 = vmatprep.mubr.bf16.mxu0 %v2199_v2  ;;  %v1463_v34 = vld [vmem:[#allocation2 + $0x30] sm:$0xff] }
 0x212   : > { %v1464_v11 = vld [vmem:[#allocation2 + $0x38] sm:$0xff] }
 0x213   : > { %v1468_v14 = vpack.c.bf16 %v1464_v11, %v1463_v34 }
 0x215   : > { %1842 = vmatmul.mubr.msk.bf16.gmra.mxu0 %vm386_vm2, %v1468_v14 }
 0x2bc   : > { %v1539_v5 = vpop.f32.mrf.mxu0 }
 0x2bd   : > { %v1540_v2 = vadd.f32 %v1539_v5, %v1476_v21 }
 0x2be   : > { %v1541_v24 = vpop.f32.mrf.mxu0 }
 0x2bf   : > { %1578 = vst [vmem:[%s2632_s15] sm:$0xff] %v1540_v2  ;;  %v1542_v25 = vadd.f32 %v1541_v24, %v1480_v22 }
 0x2c0   : > { %v1543_v27 = vpop.f32.mrf.mxu0 }
 0x2c1   : > { %1579 = vst [vmem:[%s2632_s15 + $0x8] sm:$0xff] %v1542_v25  ;;  %v1544_v28 = vadd.f32 %v1543_v27, %v1476_v21 }
 0x2c2   : > { %v1545_v31 = vpop.f32.mrf.mxu0 }
 0x2c3   : > { %1580 = vst [vmem:[%s2632_s15 + $0x10] sm:$0xff] %v1544_v28  ;;  %v1546_v32 = vadd.f32 %v1545_v31, %v1480_v22 }
 0x2c5   : > { %v1549_v35 = vpop.f32.mrf.mxu0  ;;  %1581 = vst [vmem:[%s2632_s15 + $0x18] sm:$0xff] %v1546_v32 }
 0x2c6   : > { %v1550_v36 = vadd.f32 %v1549_v35, %v1476_v21 }
 0x2c7   : > { %v1551_v39 = vpop.f32.mrf.mxu0 }
 0x2c8   : > { %1582 = vst [vmem:[%s2632_s15 + $0x20] sm:$0xff] %v1550_v36  ;;  %v1552_v0 = vadd.f32 %v1551_v39, %v1480_v22 }
 0x2c9   : > { %v1553_v38 = vpop.f32.mrf.mxu0 }
 0x2ca   : > { %1583 = vst [vmem:[%s2632_s15 + $0x28] sm:$0xff] %v1552_v0  ;;  %v1554_v59 = vadd.f32 %v1553_v38, %v1476_v21 }
 0x2cb   : > { %v1555_v3 = vpop.f32.mrf.mxu0 }
 0x2cc   : > { %1584 = vst [vmem:[%s2632_s15 + $0x30] sm:$0xff] %v1554_v59  ;;  %v1556_v63 = vadd.f32 %v1555_v3, %v1480_v22 }
 0x2cd   : > { %v1559_v40 = vpop.f32.mrf.mxu0 }
 0x2ce   : > { %1585 = vst [vmem:[%s2632_s15 + $0x38] sm:$0xff] %v1556_v63  ;;  %v1560_v6 = vadd.f32 %v1559_v40, %v1476_v21 }
 0x2cf   : > { %v1561_v29 = vpop.f32.mrf.mxu0 }
 0x2d0   : > { %1586 = vst [vmem:[%s2632_s15 + $0x40] sm:$0xff] %v1560_v6  ;;  %v1562_v42 = vadd.f32 %v1561_v29, %v1480_v22 }
 0x2d1   : > { %v1563_v43 = vpop.f32.mrf.mxu0 }
 0x2d2   : > { %1587 = vst [vmem:[%s2632_s15 + $0x48] sm:$0xff] %v1562_v42  ;;  %v1564_v53 = vadd.f32 %v1563_v43, %v1476_v21 }
 0x2d3   : > { %v1565_v62 = vpop.f32.mrf.mxu0 }
 0x2d4   : > { %1588 = vst [vmem:[%s2632_s15 + $0x50] sm:$0xff] %v1564_v53  ;;  %v1566_v18 = vadd.f32 %v1565_v62, %v1480_v22 }
 0x2d5   : > { %v1569_v48 = vpop.f32.mrf.mxu0 }
 0x2d6   : > { %1589 = vst [vmem:[%s2632_s15 + $0x58] sm:$0xff] %v1566_v18  ;;  %v1570_v33 = vadd.f32 %v1569_v48, %v1476_v21 }
 0x2d7   : > { %v1571_v20 = vpop.f32.mrf.mxu0 }
 0x2d8   : > { %1590 = vst [vmem:[%s2632_s15 + $0x60] sm:$0xff] %v1570_v33  ;;  %v1572_v46 = vadd.f32 %v1571_v20, %v1480_v22 }
 0x2d9   : > { %v1573_v49 = vpop.f32.mrf.mxu0 }
 0x2da   : > { %1591 = vst [vmem:[%s2632_s15 + $0x68] sm:$0xff] %v1572_v46  ;;  %v1574_v30 = vadd.f32 %v1573_v49, %v1476_v21 }
 0x2db   : > { %v1575_v51 = vpop.f32.mrf.mxu0 }
 0x2dc   : > { %1592 = vst [vmem:[%s2632_s15 + $0x70] sm:$0xff] %v1574_v30  ;;  %v1576_v52 = vadd.f32 %v1575_v51, %v1480_v22 }
 0x2de   : > { %1593 = vst [vmem:[%s2632_s15 + $0x78] sm:$0xff] %v1576_v52 }
 0x2df   : > { %2134 = shalt.err (!%p2131_p5)
}
 0x2e0   : > { %s2135_s30 = scalar_lea.hbm %s2653_s20, 2048  ;;  %s2139_s15 = scalar_lea.hbm %s2713_s7, 4096 }
 0x2e1   : > { %p2136_p6 = scmp.ne.s32.totalorder %s2653_s20, %s2135_s30  ;;  %p2140_p10 = scmp.lt.s32.totalorder %s2653_s20, %s2713_s7 }
 0x2e2   : > { %p2141_p11 = scmp.lt.s32.totalorder %s2139_s15, %s2135_s30 }
 0x2e3   : > { %p2137_p7 = pnand %p2136_p6, %p2284_p4 }
 0x2e4   : > { %p2142_p12 = por %p2141_p11, %p2140_p10 }
 0x2e5   : > { %p2138_p9 = pneg %p2137_p7 }
 0x2e7   : > { %p2143_p13 = pnand %p2142_p12, %p2138_p9 }
 0x2e9   : > { %2146 = shalt.err (!%p2143_p13)
}
 0x2ea   : > { %s2202_s17 = smov 256   ;;  %s2203_s21 = smov 16  }
 0x2eb   : > { %1935 = dma.vmem_to_hbm [thread:$0]  (%p2284_p4), %s2655_s18, 2048, %s2653_s20, %s2661_s27, %s2202_s17, %s2202_s17, %s2203_s21  }
 0x2ec PF: > { %p1941_p0 = scmp.ge.s32.totalorder %s2197_s29, 2  ;;  %s1624_s22 = sand.u32 1, %s2177_s24  }
 0x2ed   : > { %s1625_s23 = scalar_lea.sflag [#allocation4], %s1624_s22 }
 0x2ee   : > { %p1938_p1 = pnand %p1941_p0, %p2291_p8 }
 0x2f0   : > { %p1939_p2 = pneg %p1938_p1 }
 0x2f2   : > { %2172 = dma.done.wait (%p1939_p2), %s1625_s23, 2048  }
 0x2f3   : > { %2174 = vsyncadd (%p1939_p2), %s1625_s23, 4294965248  ;;  %s20_s29 = sadd.s32 1, %s2197_s29   ;;  %s2716_s24 = smov %s2181_s25 }
 0x2f4   : > { %p17_p3 = scmp.ge.s32.totalorder %s20_s29, 4   ;;  %s2717_s25 = smov %s2185_s26 }
 0x2f5   : > { %s2718_s26 = smov %s2297_s14  ;;  %s2719_s27 = smov %s2193_s28 }
 0x2f6   : > { %s2720_s28 = smov %s2722_s9  ;;  %19 = sbr.rel (!%p17_p3) target bundleno = 4 (0x4), region = 103 }
 0x2fb   :  { %1630 = vsyncpa [#allocation4], 1 }
 0x2fc   :  { %1632 = vsyncpa [#allocation4 + $0x1], 1 }

</bundles_post_ra>
